<compile_context>
chip_gen: v6e
topology: v6e:2x2x1
jax: 0.10.0
libtpu: 0.0.40
codegen_flags: <defaults>
</compile_context>

<pallas_src>
import math

import jax
import jax.numpy as jnp
from jax.experimental import pallas as pl
from jax.experimental.pallas import tpu as pltpu


def _shortcut_add_kernel(x_ref, skip_ref, o_ref):
    # Elementwise residual add on the current VMEM tile (VPU).
    o_ref[...] = x_ref[...] + skip_ref[...]


_MAX_LANE_COLS = 4096               # 32 * 128 lanes; one f32 row = 16 KiB
_VMEM_HEADROOM = 4 * 1024 * 1024    # compiler-internal scratch headroom


def _sublane_multiple(dtype):
    # Full sublane packing: 8 rows for 4-byte, 16 for 2-byte, 32 for 1-byte.
    itemsize = jnp.dtype(dtype).itemsize
    return max(8, 32 // max(itemsize, 1))


def _tpu_budgets():
    """(default_block_bytes, vmem_limit_cap) tuned to the TPU generation."""
    try:
        info = pltpu.get_tpu_info()
        vmem_cap = int(getattr(info, "vmem_capacity_bytes", 0) or 0)
    except Exception:  # non-TPU trace / older API: fall back conservatively
        vmem_cap = 0
    if vmem_cap and vmem_cap <= 64 * 1024 * 1024:
        # v7x-class: 64 MiB VMEM per TensorCore -> keep resident footprint low.
        return 4 * 1024 * 1024, 40 * 1024 * 1024
    # v5e / v6e: 128 MiB physical VMEM; a 48 MiB explicit limit is free headroom.
    return 4 * 1024 * 1024, 48 * 1024 * 1024


def _pick_cols(total):
    """Largest lane-dense column count (multiple of 128, capped) dividing total."""
    for k in range(_MAX_LANE_COLS // 128, 0, -1):
        cols = 128 * k
        if total % cols == 0:
            return cols
    return 0


def _pick_tiles(rows, cols, dtype, target_block_bytes):
    """VMEM-budgeted block shape; never degenerates to the whole huge array."""
    itemsize = jnp.dtype(dtype).itemsize
    sub = _sublane_multiple(dtype)
    row_bytes = cols * itemsize

    if row_bytes * sub > target_block_bytes and cols > 128:
        # Even `sub` full-width rows blow the budget: tile the lane dim too.
        tc = max(128, (target_block_bytes // (sub * itemsize)) // 128 * 128)
        tc = min(tc, cols)                      # == cols -> full extent (legal)
        tr = rows if rows < sub else sub        # full extent or multiple of 8
    else:
        tc = cols                               # full, lane-dense last dim
        budget_rows = max(sub, (target_block_bytes // max(row_bytes, 1)) // sub * sub)
        tr = rows if budget_rows >= rows else budget_rows
        # Keep >= 2 row-blocks when possible so the "parallel" grid axis can be
        # sharded across both TensorCores on v7x (harmless on single-TC chips).
        if tr == rows and rows > sub:
            tr = max(sub, (rows // (2 * sub)) * sub)
    return tr, tc


def shortcut_layer(x, from_layer_output, *, donate_x=False,
                   target_block_bytes=None,
                   min_pallas_bytes=2 * 1024 * 1024):
    """Darknet shortcut: x + layer_outputs[from_layer] (Pallas TPU kernel)."""
    assert x.shape == from_layer_output.shape, "shortcut requires matching shapes"
    assert x.dtype == from_layer_output.dtype, "shortcut requires matching dtypes"

    itemsize = jnp.dtype(x.dtype).itemsize
    total = math.prod(x.shape) if x.shape else 1
    total_bytes = total * itemsize

    # Fast path: tiny tensors can't amortize kernel-launch / per-step overhead;
    # a plain (fusable) XLA add is strictly better.
    if total_bytes <= min_pallas_bytes:
        return x + from_layer_output

    default_block, vmem_cap = _tpu_budgets()
    if target_block_bytes is None:
        target_block_bytes = default_block
    # Never let 3 refs x 2 buffers x block (+ headroom) exceed the scoped budget.
    target_block_bytes = max(
        128 * 128 * itemsize,
        min(target_block_bytes, (vmem_cap - _VMEM_HEADROOM) // 6))

    # Lane-dense (rows, cols) re-view. If total % 128 != 0, pad the flat tail
    # so every block keeps a full-multiple-of-128 last dim (unmasked stores),
    # then slice the result back.
    sub = _sublane_multiple(x.dtype)
    x_flat = x.reshape(-1)
    s_flat = from_layer_output.reshape(-1)
    cols = _pick_cols(total)
    padded_total = total
    if cols == 0:
        padded_total = -(-total // (sub * 128)) * (sub * 128)
        pad = padded_total - total
        x_flat = jnp.pad(x_flat, (0, pad))
        s_flat = jnp.pad(s_flat, (0, pad))
        cols = _pick_cols(padded_total)
    rows = padded_total // cols

    tr, tc = _pick_tiles(rows, cols, x.dtype, target_block_bytes)

    x2 = x_flat.reshape(rows, cols)
    s2 = s_flat.reshape(rows, cols)

    if tc == cols:
        # Common case: fully contiguous HBM chunks -> collapse to a 1-D grid.
        grid = (pl.cdiv(rows, tr),)
        index_map = lambda i: (i, 0)
        dim_sem = ("parallel",)
    else:
        grid = (pl.cdiv(rows, tr), pl.cdiv(cols, tc))
        index_map = lambda i, j: (i, j)
        dim_sem = ("parallel", "parallel")

    tile_bytes = tr * tc * itemsize
    # 3 refs x 2 buffers + headroom, clamped to the generation-aware cap.
    vmem_limit = int(min(vmem_cap,
                         max(24 * 1024 * 1024, 6 * tile_bytes + _VMEM_HEADROOM)))

    out2 = pl.pallas_call(
        _shortcut_add_kernel,
        out_shape=jax.ShapeDtypeStruct((rows, cols), x.dtype),
        grid_spec=pltpu.PrefetchScalarGridSpec(
            num_scalar_prefetch=0,
            grid=grid,
            in_specs=[
                pl.BlockSpec((tr, tc), index_map),
                pl.BlockSpec((tr, tc), index_map),
            ],
            out_specs=pl.BlockSpec((tr, tc), index_map),
        ),
        # Donation is opt-in: if x stays live (typical darknet graphs keep it
        # in layer_outputs), an unconditional alias forces a defensive copy.
        input_output_aliases=({0: 0} if donate_x else {}),
        compiler_params=pltpu.CompilerParams(
            dimension_semantics=dim_sem,
            vmem_limit_bytes=vmem_limit,
        ),
    )(x2, s2)

    out_flat = out2.reshape(-1)
    if padded_total != total:
        out_flat = out_flat[:total]
    return out_flat.reshape(x.shape)


class ShortcutLayer:
    """JAX/Pallas port of the darknet ShortcutLayer (no learnable params)."""

    def __init__(self, from_layer, activation="linear"):
        self.has_learnable_params = False
        self.requires_layer_outputs = True
        self.is_output_layer = False
        self.from_layer = from_layer
        self.activation = activation
        if self.activation != "linear" and self.activation is not None:
            print("ShortcutLayer: Warning: Ignoring unrecognized activation:",
                  self.activation)

    def get_required_layers(self):
        return (self.from_layer,)

    def to_string(self):
        return "SHCT: layer: %d  activ: %s" % (self.from_layer, self.activation)

    def __call__(self, x, layer_outputs):
        return shortcut_layer(x, layer_outputs[self.from_layer])


if __name__ == "__main__":
    key = jax.random.PRNGKey(0)
    k1, k2, k3, k4 = jax.random.split(key, 4)

    # Small NCHW shape consistent with the module's conv-net usage.
    n, c, h, w = 2, 4, 16, 16
    x = jax.random.normal(k1, (n, c, h, w), dtype=jnp.float32)
    prev = jax.random.normal(k2, (n, c, h, w), dtype=jnp.float32)

    # Emulate the darknet layer_outputs list; from_layer = 0.
    layer_outputs = [prev]
    layer = ShortcutLayer(from_layer=0, activation="linear")
    ref = x + prev

    # 1) Default path: tiny tensor -> XLA fast path (no Pallas launch).
    out = jax.block_until_ready(layer(x, layer_outputs))
    assert out.shape == (n, c, h, w)
    assert out.dtype == x.dtype
    assert jnp.allclose(out, ref, atol=1e-6), "mismatch vs reference add"

    # 2) Force the Pallas kernel on the same small tensors (lane-dense 1-D grid).
    out_k = jax.block_until_ready(shortcut_layer(x, prev, min_pallas_bytes=0))
    assert jnp.allclose(out_k, ref, atol=1e-6), "mismatch on forced Pallas path"

    # 3) Forced Pallas with a tiny block budget -> 2-D grid, ragged row blocks.
    xb = jax.random.normal(k3, (1, 20, 64, 64), dtype=jnp.float32)
    pb = jax.random.normal(k4, (1, 20, 64, 64), dtype=jnp.float32)
    out_b = jax.block_until_ready(
        shortcut_layer(xb, pb, min_pallas_bytes=0, target_block_bytes=64 * 1024))
    assert jnp.allclose(out_b, xb + pb, atol=1e-6), "mismatch on tiled/ragged shape"

    # 4) total % 128 != 0 -> pad-to-lane-dense path (+ opt-in donation).
    xc = jax.random.normal(k1, (2, 3, 13, 13), dtype=jnp.float32)
    pc = jax.random.normal(k2, (2, 3, 13, 13), dtype=jnp.float32)
    out_c = jax.block_until_ready(
        shortcut_layer(xc, pc, min_pallas_bytes=0, donate_x=True))
    assert jnp.allclose(out_c, xc + pc, atol=1e-6), "mismatch on padded path"

    print("KERNEL_OK")
</pallas_src>

<mosaic_0001>
module attributes {stable_mosaic.version = 11 : i64} {
  func.func @_shortcut_add_kernel(%arg0: i32, %arg1: memref<1x2048xf32, #tpu.memory_space<vmem>>, %arg2: memref<1x2048xf32, #tpu.memory_space<vmem>>, %arg3: memref<1x2048xf32, #tpu.memory_space<vmem>>) attributes {dimension_semantics = [#tpu.dimension_semantics<parallel>], iteration_bounds = array<i64: 1>, scalar_prefetch = 0 : i64, scratch_operands = 0 : i64, tpu.core_type = #tpu.core_type<tc>, window_params = [{transform_indices = @transform_0, window_bounds = array<i64: 1, 2048>}, {transform_indices = @transform_1, window_bounds = array<i64: 1, 2048>}, {transform_indices = @transform_2, window_bounds = array<i64: 1, 2048>}]} {
    %c0 = arith.constant 0 : index
    %c0_0 = arith.constant 0 : index
    %0 = vector.load %arg1[%c0, %c0_0] : memref<1x2048xf32, #tpu.memory_space<vmem>>, vector<1x2048xf32>
    %c0_1 = arith.constant 0 : index
    %c0_2 = arith.constant 0 : index
    %1 = vector.load %arg2[%c0_1, %c0_2] : memref<1x2048xf32, #tpu.memory_space<vmem>>, vector<1x2048xf32>
    %2 = arith.addf %0, %1 : vector<1x2048xf32>
    %c0_3 = arith.constant 0 : index
    %c0_4 = arith.constant 0 : index
    %3 = vector.load %arg3[%c0_3, %c0_4] : memref<1x2048xf32, #tpu.memory_space<vmem>>, vector<1x2048xf32>
    tpu.vector_store %arg3[%c0_3, %c0_4], %2 {strides = array<i32>} : memref<1x2048xf32, #tpu.memory_space<vmem>>, vector<1x2048xf32>,
    return
  }
  func.func @transform_0(%arg0: i32) -> (i32, i32) {
    %c0_i32 = arith.constant 0 : i32
    %c0_i32_0 = arith.constant 0 : i32
    return %arg0, %c0_i32 : i32, i32
  }
  func.func @transform_1(%arg0: i32) -> (i32, i32) {
    %c0_i32 = arith.constant 0 : i32
    %c0_i32_0 = arith.constant 0 : i32
    return %arg0, %c0_i32 : i32, i32
  }
  func.func @transform_2(%arg0: i32) -> (i32, i32) {
    %c0_i32 = arith.constant 0 : i32
    %c0_i32_0 = arith.constant 0 : i32
    return %arg0, %c0_i32 : i32, i32
  }
}

</mosaic_0001>

<bundles_post_ra>
// kernel: tpu_custom_call.1
= control target key start
LH: loop header
LB: loop body
LE: loop exit
PB: predicated region body
PF: predicated region fallthrough
CT: control target
= control target key end

     0   :  { %7 = vsyncpa [#allocation3], 0  ;;  %s156_s0 = inlined_call_operand.hbm [shape: f32[1,2048], index: 0, kind: input, shape index: {}]   ;;  %s157_s1 = inlined_call_operand.hbm [shape: f32[1,2048], index: 1, kind: input, shape index: {}]   ;;  %s158_s2 = inlined_call_operand.hbm [shape: f32[1,2048], index: 2, kind: output, shape index: {}]  }
   0x1   :  { %8 = vsyncpa [#allocation6], 0 }
   0x2   :  { %9 = vsyncpa [#allocation4], 0  ;;  %s129_s9 = smov [#allocation2]   ;;  %s130_s11 = smov [#allocation5]  }
   0x3   :  { %s16_s10 = sshll.u32 %s129_s9, 4  ;;  %s26_s12 = sshll.u32 %s130_s11, 4  ;;  %s17_s10 = int_to_ptr.vmem [resolvable:$true] %s16_s10  ;;  %s27_s12 = int_to_ptr.vmem [resolvable:$true] %s26_s12 }
   0x4   :  { %s71_s13 = scalar_lea.vmem %s17_s10, 256  ;;  %p76_p1 = scmp.lt.s32.totalorder %s17_s10, %s17_s10 }
   0x5   :  { %p72_p0 = scmp.ne.s32.totalorder %s17_s10, %s71_s13  ;;  %p77_p2 = scmp.lt.s32.totalorder %s71_s13, %s71_s13 }
   0x7   :  { %p78_p3 = por %p77_p2, %p76_p1 }
   0x9   :  { %p79_p4 = pnand %p78_p3, %p72_p0 }
   0xb   :  { %82 = shalt.err (!%p79_p4)
}
   0xc   :  { %19 = dma.hbm_to_vmem [thread:$0]  %s156_s0, 256, %s17_s10, [#allocation3]  }
   0xd   :  { %s91_s16 = scalar_lea.vmem %s27_s12, 256  ;;  %p96_p6 = scmp.lt.s32.totalorder %s27_s12, %s27_s12 }
   0xe   :  { %p92_p5 = scmp.ne.s32.totalorder %s27_s12, %s91_s16  ;;  %p97_p7 = scmp.lt.s32.totalorder %s91_s16, %s91_s16 }
  0x10   :  { %p98_p8 = por %p97_p7, %p96_p6 }
  0x12   :  { %p99_p9 = pnand %p98_p8, %p92_p5 }
  0x14   :  { %102 = shalt.err (!%p99_p9)
}
  0x15   :  { %29 = dma.hbm_to_vmem [thread:$0]  %s157_s1, 256, %s27_s12, [#allocation6]  }
  0x16   :  { %123 = dma.done.wait [#allocation3], 256  }
  0x17   :  { %124 = vsyncadd [#allocation3], 4294967040 }
  0x18   :  { %125 = dma.done.wait [#allocation6], 256  }
  0x19   :  { %126 = vsyncadd [#allocation6], 4294967040  ;;  %s131_s19 = smov [#allocation7]   ;;  %v36_v0 = vld [vmem:[#allocation2] sm:$0xff]  ;;  %v38_v1 = vld [vmem:[#allocation5] sm:$0xff] }
  0x1a   :  { %s50_s20 = sshll.u32 %s131_s19, 4  ;;  %v37_v2 = vld [vmem:[#allocation2 + $0x8] sm:$0xff]  ;;  %v40_v3 = vadd.f32 %v38_v1, %v36_v0  ;;  %v39_v4 = vld [vmem:[#allocation5 + $0x8] sm:$0xff]  ;;  %s51_s20 = int_to_ptr.vmem [resolvable:$true] %s50_s20 }
  0x1b   :  { %v41_v5 = vadd.f32 %v39_v4, %v37_v2  ;;  %s103_s0 = scalar_lea.vmem %s51_s20, 256  ;;  %p108_p11 = scmp.lt.s32.totalorder %s51_s20, %s51_s20 }
  0x1c   :  { %42 = vst [vmem:[#allocation7] sm:$0xff] %v40_v3  ;;  %p104_p10 = scmp.ne.s32.totalorder %s51_s20, %s103_s0  ;;  %p109_p12 = scmp.lt.s32.totalorder %s103_s0, %s103_s0 }
  0x1d   :  { %43 = vst [vmem:[#allocation7 + $0x8] sm:$0xff] %v41_v5 }
  0x1e   :  { %p110_p13 = por %p109_p12, %p108_p11 }
  0x20   :  { %p111_p0 = pnand %p110_p13, %p104_p10 }
  0x22   :  { %114 = shalt.err (!%p111_p0)
}
  0x23   :  { %53 = dma.vmem_to_hbm [thread:$0]  %s51_s20, 256, %s158_s2, [#allocation4]  }
  0x24   :  { %127 = dma.done.wait [#allocation4], 256  }
  0x25   :  { %128 = vsyncadd [#allocation4], 4294967040 }
  0x26   :  { %57 = vsyncpa [#allocation3], 1 }
  0x27   :  { %58 = vsyncpa [#allocation6], 1 }
  0x28   :  { %59 = vsyncpa [#allocation4], 1 }

</bundles_post_ra>
